<compile_context>
chip_gen: v5e
topology: v5e:2x2
jax: 0.10.0
libtpu: 0.0.40
codegen_flags: <defaults>
</compile_context>

<pallas_src>
import functools

import jax
import jax.numpy as jnp
from jax.experimental import pallas as pl
from jax.experimental.pallas import tpu as pltpu


def _round_up(x, m):
    return (x + m - 1) // m * m


def _vmem_limit_bytes():
    # ~96 MiB scoped limit on v5e/v6e (128 MiB physical), ~48 MiB on v7x (64 MiB physical / TC).
    try:
        info = pltpu.get_tpu_info()
        cap = None
        for name in ("vmem_capacity_bytes", "vmem_size_bytes", "vmem_bytes"):
            cap = getattr(info, name, None)
            if cap:
                break
        if cap and cap > 80 * 1024 * 1024:
            return 96 * 1024 * 1024
        return 48 * 1024 * 1024
    except Exception:
        return 48 * 1024 * 1024


VMEM_LIMIT = _vmem_limit_bytes()
# Target per-block working set for the row-tiled conv (smaller on 64 MiB-VMEM parts).
CONV_TILE_BYTES = (3 if VMEM_LIMIT <= 48 * 1024 * 1024 else 6) * 1024 * 1024


def _cparams(dims):
    return pltpu.CompilerParams(dimension_semantics=dims, vmem_limit_bytes=VMEM_LIMIT)


# --------------------------------------------------------------------------------------
# Pallas kernels
# --------------------------------------------------------------------------------------
def _matmul_kernel(a_ref, b_ref, bias_ref, o_ref, acc_ref, *, act):
    @pl.when(pl.program_id(2) == 0)
    def _():
        acc_ref[...] = jnp.zeros_like(acc_ref)

    acc_ref[...] += jnp.dot(a_ref[...], b_ref[...], preferred_element_type=jnp.float32)

    @pl.when(pl.program_id(2) == pl.num_programs(2) - 1)
    def _():
        out = acc_ref[...] + bias_ref[...]
        if act == "relu":
            out = jnp.maximum(out, 0.0)
        o_ref[...] = out.astype(o_ref.dtype)


def matmul_pallas(a, b, bias=None, act="none", out_dtype=jnp.float32):
    """(M, K) @ (K, N) -> (M, N).  bf16 MXU inputs, f32 accumulation, fused bias / ReLU epilogue.
    N is always padded to a multiple of 128 so the output store is lane-dense."""
    M, K = a.shape
    K2, N = b.shape
    assert K == K2
    a = a.astype(jnp.bfloat16)
    b = b.astype(jnp.bfloat16)

    if M <= 256:
        TM = _round_up(M, 8)
        Mp = TM
    elif M <= 1024:
        TM = 256
        Mp = _round_up(M, TM)
    else:
        TM = 512
        Mp = _round_up(M, TM)

    Np = _round_up(N, 128)
    if Np <= 1024:
        TN = Np
    else:
        TN = 512
        Np = _round_up(N, TN)

    if K <= 1024:
        TK, Kp = K, K
    else:
        TK = 512
        Kp = _round_up(K, TK)

    if (Mp, Kp) != (M, K):
        a = jnp.pad(a, ((0, Mp - M), (0, Kp - K)))
    if (Kp, Np) != (K, N):
        b = jnp.pad(b, ((0, Kp - K), (0, Np - N)))
    bias_v = jnp.zeros((N,), jnp.float32) if bias is None else bias.astype(jnp.float32)
    if Np != N:
        bias_v = jnp.pad(bias_v, (0, Np - N))
    bias_v = bias_v.reshape(1, Np)

    out = pl.pallas_call(
        functools.partial(_matmul_kernel, act=act),
        out_shape=jax.ShapeDtypeStruct((Mp, Np), out_dtype),
        grid_spec=pltpu.PrefetchScalarGridSpec(
            num_scalar_prefetch=0,
            grid=(Mp // TM, Np // TN, Kp // TK),
            in_specs=[
                pl.BlockSpec((TM, TK), lambda i, j, k: (i, k)),
                pl.BlockSpec((TK, TN), lambda i, j, k: (k, j)),
                pl.BlockSpec((1, TN), lambda i, j, k: (0, j)),
            ],
            out_specs=pl.BlockSpec((TM, TN), lambda i, j, k: (i, j)),
            scratch_shapes=[pltpu.VMEM((TM, TN), jnp.float32)],
        ),
        compiler_params=_cparams(("parallel", "parallel", "arbitrary")),
    )(a, b, bias_v)
    if (Mp, Np) != (M, N):
        out = out[:M, :N]
    return out


def _bmm_nt_kernel(a_ref, b_ref, o_ref, *, scale):
    c = jax.lax.dot_general(a_ref[0], b_ref[0], (((1,), (1,)), ((), ())),
                            preferred_element_type=jnp.float32)
    o_ref[0] = (c * scale).astype(o_ref.dtype)


def bmm_nt_pallas(a, b, scale=1.0, out_dtype=jnp.float32):
    """(G, M, K) @ (G, N, K)^T -> (G, M, N).  Scale fused into the epilogue; bf16 MXU inputs."""
    G, M, K = a.shape
    N = b.shape[1]
    a = a.astype(jnp.bfloat16)
    b = b.astype(jnp.bfloat16)
    if N <= 2048:
        TN, Np = N, N
    else:
        TN = 1024
        Np = _round_up(N, TN)
        b = jnp.pad(b, ((0, 0), (0, Np - N), (0, 0)))
    out = pl.pallas_call(
        functools.partial(_bmm_nt_kernel, scale=scale),
        out_shape=jax.ShapeDtypeStruct((G, M, Np), out_dtype),
        grid=(G, Np // TN),
        in_specs=[
            pl.BlockSpec((1, M, K), lambda g, n: (g, 0, 0)),
            pl.BlockSpec((1, TN, K), lambda g, n: (g, n, 0)),
        ],
        out_specs=pl.BlockSpec((1, M, TN), lambda g, n: (g, 0, n)),
        compiler_params=_cparams(("parallel", "parallel")),
    )(a, b)
    return out if Np == N else out[:, :, :N]


def _attn_kernel(q_ref, k_ref, v_ref, o_ref, *, scale):
    gb, h, tq, dh = q_ref.shape
    tk = k_ref.shape[2]
    q = q_ref[...].reshape(gb * h, tq, dh)
    k = k_ref[...].reshape(gb * h, tk, dh)
    v = v_ref[...].reshape(gb * h, tk, dh)
    s = jnp.einsum("hqd,hkd->hqk", q, k, preferred_element_type=jnp.float32) * scale
    s = s - jnp.max(s, axis=-1, keepdims=True)
    p = jnp.exp(s)
    p = p * pl.reciprocal(jnp.sum(p, axis=-1, keepdims=True), approx=True)
    o = jnp.einsum("hqk,hkd->hqd", p.astype(q.dtype), v, preferred_element_type=jnp.float32)
    o_ref[...] = o.reshape(gb, h, tq, dh).astype(o_ref.dtype)


def _attn_group(G, H, Tq, Tk):
    """Largest divisor of G (<=16) that keeps >=2 parallel grid steps and a modest score block."""
    budget = 6 * 1024 * 1024
    best = 1
    for d in range(1, min(G, 16) + 1):
        if G % d != 0:
            continue
        if G // d < 2 and G >= 2:
            continue
        if d * H * Tq * Tk * 12 > budget:
            continue
        best = d
    return best


def attention_pallas(q, k, v, scale, out_dtype=jnp.float32):
    """Fused scale + softmax + @V attention.  q: (G, H, Tq, dh); k, v: (G, H, Tk, dh).
    Several batch elements are processed per grid step; softmax reciprocal runs on the EUP."""
    G, H, Tq, dh = q.shape
    Tk = k.shape[2]
    q = q.astype(jnp.bfloat16)
    k = k.astype(jnp.bfloat16)
    v = v.astype(jnp.bfloat16)
    GB = _attn_group(G, H, Tq, Tk)
    # TODO(synk): dh < 128 heads still underfill vreg lanes / MXU depth; a (Tq, H*dh) kernel
    # layout with sublane head split would fix that.
    # TODO(synk): no Tk tiling / online softmax; very long context lengths would need it.
    return pl.pallas_call(
        functools.partial(_attn_kernel, scale=scale),
        out_shape=jax.ShapeDtypeStruct((G, H, Tq, dh), out_dtype),
        grid=(G // GB,),
        in_specs=[
            pl.BlockSpec((GB, H, Tq, dh), lambda g: (g, 0, 0, 0)),
            pl.BlockSpec((GB, H, Tk, dh), lambda g: (g, 0, 0, 0)),
            pl.BlockSpec((GB, H, Tk, dh), lambda g: (g, 0, 0, 0)),
        ],
        out_specs=pl.BlockSpec((GB, H, Tq, dh), lambda g: (g, 0, 0, 0)),
        compiler_params=_cparams(("parallel",)),
    )(q, k, v)


def _ln_kernel(x_ref, g_ref, b_ref, o_ref, *, eps):
    x = x_ref[...].astype(jnp.float32)          # upcast in-kernel: input DMA stays native dtype
    mu = jnp.mean(x, axis=-1, keepdims=True)
    xc = x - mu
    var = jnp.mean(xc * xc, axis=-1, keepdims=True)
    o_ref[...] = (xc * jax.lax.rsqrt(var + eps) * g_ref[...] + b_ref[...]).astype(o_ref.dtype)


def layernorm_pallas(x, gamma, beta, eps=1e-5, out_dtype=None):
    """LayerNorm over the last dim (also used for GroupNorm(1, C) on (R, C))."""
    orig_shape = x.shape
    D = orig_shape[-1]
    if out_dtype is None:
        out_dtype = x.dtype
    x2 = x.reshape(-1, D)
    R = x2.shape[0]
    TR = _round_up(R, 8) if R <= 1024 else 512
    Rp = _round_up(R, TR)
    if Rp != R:
        x2 = jnp.pad(x2, ((0, Rp - R), (0, 0)))
    g = gamma.reshape(1, D).astype(jnp.float32)
    b = beta.reshape(1, D).astype(jnp.float32)
    out = pl.pallas_call(
        functools.partial(_ln_kernel, eps=eps),
        out_shape=jax.ShapeDtypeStruct((Rp, D), out_dtype),
        grid=(Rp // TR,),
        in_specs=[
            pl.BlockSpec((TR, D), lambda i: (i, 0)),
            pl.BlockSpec((1, D), lambda i: (0, 0)),
            pl.BlockSpec((1, D), lambda i: (0, 0)),
        ],
        out_specs=pl.BlockSpec((TR, D), lambda i: (i, 0)),
        compiler_params=_cparams(("parallel",)),
    )(x2, g, b)
    if Rp != R:
        out = out[:R]
    return out.reshape(orig_shape)


def ln_noaffine(x, eps=1e-6):
    D = x.shape[-1]
    return layernorm_pallas(x, jnp.ones((D,), jnp.float32), jnp.zeros((D,), jnp.float32), eps=eps)


# ---- fused NHWC stride-1 conv: row-tiled, manual double-buffered input DMA ---------------
def _conv_s1_kernel(x_hbm, w_ref, b_ref, o_ref, xbuf, acc_ref, sem, *,
                    k, tr, ow, r_tiles, act):
    step = pl.program_id(0)
    trin = tr + k - 1
    cin = w_ref.shape[1]

    def fetch(s, slot):
        b = s // r_tiles
        r = s % r_tiles
        pltpu.make_async_copy(x_hbm.at[b, pl.ds(r * tr, trin)],
                              xbuf.at[slot], sem.at[slot]).start()

    @pl.when(step == 0)
    def _():
        fetch(0, 0)

    slot = step % 2
    pltpu.make_async_copy(x_hbm.at[0, pl.ds(0, trin)],
                          xbuf.at[slot], sem.at[slot]).wait()

    @pl.when(step + 1 < pl.num_programs(0))
    def _():
        fetch(step + 1, 1 - slot)

    acc_ref[...] = jnp.zeros_like(acc_ref)
    for i in range(k):
        for j in range(k):
            xs = xbuf[slot, i:i + tr, j:j + ow, :].reshape(tr * ow, cin)
            acc_ref[...] += jnp.dot(xs, w_ref[i * k + j],
                                    preferred_element_type=jnp.float32)
    out = acc_ref[...] + b_ref[...]
    if act == "relu":
        out = jnp.maximum(out, 0.0)
    o_ref[0] = out.reshape(tr, ow, -1).astype(o_ref.dtype)


def _conv2d_fused_s1(x, p, padding, act, out_dtype):
    """3x3 / stride-1 NHWC conv.  The input stays in HBM; (TR + k - 1)-row halo tiles are
    streamed through a double-buffered VMEM scratch; the k*k taps accumulate into a VMEM
    f32 scratch.  Bias + ReLU + output-dtype cast fused."""
    k = p["k"]
    cin = p["w"].shape[1]
    cout = p["w"].shape[2]
    B, H, W, _ = x.shape
    OH = H + 2 * padding - k + 1
    OW = W + 2 * padding - k + 1
    WP = W + 2 * padding

    row_bytes = max(OW * max(cin, cout) * 4, 1)
    TR = max(1, min(OH, CONV_TILE_BYTES // row_bytes))
    if TR >= 8:
        TR = (TR // 8) * 8
    TR = min(TR, 512)
    R = -(-OH // TR)
    OHp = R * TR

    xb = jnp.pad(x.astype(jnp.bfloat16),
                 ((0, 0), (padding, padding + (OHp - OH)), (padding, padding), (0, 0)))
    bias = p["b"] if p["b"] is not None else jnp.zeros((cout,), jnp.float32)

    out = pl.pallas_call(
        functools.partial(_conv_s1_kernel, k=k, tr=TR, ow=OW, r_tiles=R, act=act),
        out_shape=jax.ShapeDtypeStruct((B, OHp, OW, cout), out_dtype),
        grid=(B * R,),
        in_specs=[
            pl.BlockSpec(memory_space=pl.ANY),                        # padded map stays in HBM
            pl.BlockSpec((k * k, cin, cout), lambda s: (0, 0, 0)),
            pl.BlockSpec((1, cout), lambda s: (0, 0)),
        ],
        out_specs=pl.BlockSpec((1, TR, OW, cout), lambda s: (s // R, s % R, 0, 0)),
        scratch_shapes=[
            pltpu.VMEM((2, TR + k - 1, WP, cin), jnp.bfloat16),
            pltpu.VMEM((TR * OW, cout), jnp.float32),
            pltpu.SemaphoreType.DMA((2,)),
        ],
        compiler_params=_cparams(("arbitrary",)),   # manual prefetch requires sequential steps
    )(xb, p["w"].astype(jnp.bfloat16), bias.astype(jnp.float32).reshape(1, cout))
    if OHp != OH:
        out = out[:, :OH]
    return out


def im2col_nhwc(x, k, stride, padding):
    B, H, W, C = x.shape
    xp = jnp.pad(x, ((0, 0), (padding, padding), (padding, padding), (0, 0)))
    OH = (H + 2 * padding - k) // stride + 1
    OW = (W + 2 * padding - k) // stride + 1
    cols = []
    for i in range(k):
        for j in range(k):
            cols.append(xp[:, i:i + stride * OH:stride, j:j + stride * OW:stride, :])
    cols = jnp.stack(cols, axis=3)                       # (B, OH, OW, k*k, C)
    return cols.reshape(B * OH * OW, k * k * C), OH, OW


def conv2d(x, p, stride=1, padding=0, act="none", out_dtype=jnp.bfloat16):
    """NHWC conv.  stride==1 -> row-tiled fused Pallas conv; otherwise (only the single stride-2
    resize conv of the DPT) im2col + fused-epilogue Pallas GEMM."""
    if stride == 1:
        return _conv2d_fused_s1(x, p, padding, act, out_dtype)
    # TODO(synk): extend the fused row-tiled conv to stride 2 so resize3 also avoids im2col.
    B = x.shape[0]
    k = p["k"]
    cin = p["w"].shape[1]
    cout = p["w"].shape[2]
    cols, OH, OW = im2col_nhwc(x, k, stride, padding)
    out = matmul_pallas(cols, p["w"].reshape(k * k * cin, cout), bias=p["b"], act=act,
                        out_dtype=out_dtype)
    return out.reshape(B, OH, OW, cout)


# --------------------------------------------------------------------------------------
# NN building blocks (glue around the Pallas kernels)
# --------------------------------------------------------------------------------------
def linear(x, p, act="none", out_dtype=jnp.float32):
    """Pre-transposed weights: p["w"] is (Din, Dout) bf16; bias/act fused in the GEMM epilogue."""
    shp = x.shape
    out = matmul_pallas(x.reshape(-1, shp[-1]), p["w"], bias=p["b"], act=act, out_dtype=out_dtype)
    return out.reshape(shp[:-1] + (p["w"].shape[1],))


def conv_transpose_k_eq_s(x, p):
    """ConvTranspose2d with kernel_size == stride, NHWC.  GEMM + pixel shuffle; cout stays on the
    minor/lane axis through the shuffle."""
    B, H, W, cin = x.shape
    k, cout = p["k"], p["cout"]
    bias_full = jnp.tile(p["b"], k * k)                   # column order (kh, kw, cout)
    out = matmul_pallas(x.reshape(-1, cin), p["w"], bias=bias_full, out_dtype=jnp.bfloat16)
    out = out.reshape(B, H, W, k, k, cout)
    out = out.transpose(0, 1, 3, 2, 4, 5).reshape(B, H * k, W * k, cout)
    return out


def interpolate_bilinear(x, out_h, out_w):
    """F.interpolate(mode='bilinear', align_corners=True) on NHWC; keeps the input dtype."""
    B, H, W, C = x.shape
    ys = jnp.linspace(0.0, H - 1.0, out_h) if H > 1 else jnp.zeros((out_h,), jnp.float32)
    xs = jnp.linspace(0.0, W - 1.0, out_w) if W > 1 else jnp.zeros((out_w,), jnp.float32)
    y0 = jnp.floor(ys).astype(jnp.int32)
    x0 = jnp.floor(xs).astype(jnp.int32)
    y1 = jnp.minimum(y0 + 1, H - 1)
    x1 = jnp.minimum(x0 + 1, W - 1)
    wy = (ys - y0)[None, :, None, None]
    wx = (xs - x0)[None, None, :, None]
    xy0 = x[:, y0]
    xy1 = x[:, y1]
    a = xy0[:, :, x0]
    b = xy0[:, :, x1]
    c = xy1[:, :, x0]
    d = xy1[:, :, x1]
    top = a * (1 - wx) + b * wx
    bot = c * (1 - wx) + d * wx
    return (top * (1 - wy) + bot * wy).astype(x.dtype)


def bilinear_sample(inp, coords, padding_mode="border"):
    """grid_sample(align_corners=True) with pixel coords.  inp: (B,H,W,C), coords (B,R,2)=(x,y)."""
    B, H, W, C = inp.shape
    x = coords[..., 0]
    y = coords[..., 1]
    if padding_mode == "border":
        x = jnp.clip(x, 0.0, W - 1.0)
        y = jnp.clip(y, 0.0, H - 1.0)
    x0 = jnp.floor(x)
    y0 = jnp.floor(y)
    x1 = x0 + 1.0
    y1 = y0 + 1.0
    wx1 = x - x0
    wy1 = y - y0
    wx0 = 1.0 - wx1
    wy0 = 1.0 - wy1
    bidx = jnp.arange(B)[:, None]

    def gather(xi, yi):
        xi_c = jnp.clip(xi, 0, W - 1).astype(jnp.int32)
        yi_c = jnp.clip(yi, 0, H - 1).astype(jnp.int32)
        vals = inp[bidx, yi_c, xi_c]                   # (B, R, C)
        if padding_mode == "zeros":
            valid = ((xi >= 0) & (xi <= W - 1) & (yi >= 0) & (yi <= H - 1)).astype(inp.dtype)
            vals = vals * valid[..., None]
        return vals

    return (gather(x0, y0) * (wx0 * wy0)[..., None]
            + gather(x1, y0) * (wx1 * wy0)[..., None]
            + gather(x0, y1) * (wx0 * wy1)[..., None]
            + gather(x1, y1) * (wx1 * wy1)[..., None])


def sample_features4d(fmap, coords):
    return bilinear_sample(fmap, coords, padding_mode="border")       # (B, N, C)


def avg_pool2x2(x):
    B, H, W, C = x.shape
    H2, W2 = H // 2, W // 2
    x = x[:, :H2 * 2, :W2 * 2].reshape(B, H2, 2, W2, 2, C)
    return x.mean(axis=(2, 4))


def get_2d_embedding(xy, C):
    x = xy[..., 0:1]
    y = xy[..., 1:2]
    div_term = (jnp.arange(0, C, 2, dtype=jnp.float32) * (1000.0 / C)).reshape(
        (1,) * (xy.ndim - 1) + (C // 2,))
    pe_x = jnp.zeros(xy.shape[:-1] + (C,), jnp.float32)
    pe_y = jnp.zeros(xy.shape[:-1] + (C,), jnp.float32)
    pe_x = pe_x.at[..., 0::2].set(jnp.sin(x * div_term))
    pe_x = pe_x.at[..., 1::2].set(jnp.cos(x * div_term))
    pe_y = pe_y.at[..., 0::2].set(jnp.sin(y * div_term))
    pe_y = pe_y.at[..., 1::2].set(jnp.cos(y * div_term))
    return jnp.concatenate([pe_x, pe_y], axis=-1)


def get_2d_sincos_pos_embed(embed_dim, grid_size):
    H, W = grid_size
    gw, gh = jnp.meshgrid(jnp.arange(W, dtype=jnp.float32), jnp.arange(H, dtype=jnp.float32))

    def emb_1d(dim, pos):
        omega = jnp.arange(dim // 2, dtype=jnp.float32) / (dim / 2.0)
        omega = 1.0 / (10000.0 ** omega)
        out = pos.reshape(-1)[:, None] * omega[None]
        return jnp.concatenate([jnp.sin(out), jnp.cos(out)], axis=1)

    emb = jnp.concatenate([emb_1d(embed_dim // 2, gh), emb_1d(embed_dim // 2, gw)], axis=1)
    return emb.reshape(1, H, W, embed_dim)             # NHWC


# --------------------------------------------------------------------------------------
# Parameter construction (deterministic, synthetic)
# --------------------------------------------------------------------------------------
class ParamGen:
    def __init__(self, key):
        self._key = key
        self._i = 0

    def normal(self, shape, scale=1.0, dtype=jnp.float32):
        k = jax.random.fold_in(self._key, self._i)
        self._i += 1
        return (scale * jax.random.normal(k, shape)).astype(dtype)


def init_linear(pg, din, dout, bias=True):
    return {"w": pg.normal((din, dout), 1.0 / (din ** 0.5), jnp.bfloat16),
            "b": jnp.zeros((dout,), jnp.float32) if bias else None}


def init_conv(pg, cin, cout, k, bias=True):
    fan = cin * k * k
    return {"w": pg.normal((k * k, cin, cout), 1.0 / (fan ** 0.5), jnp.bfloat16),
            "b": jnp.zeros((cout,), jnp.float32) if bias else None,
            "k": k}


def init_convT(pg, cin, cout, k):
    return {"w": pg.normal((cin, k * k * cout), 1.0 / (cin ** 0.5), jnp.bfloat16),
            "b": jnp.zeros((cout,), jnp.float32), "k": k, "cout": cout}


def init_ln(dim):
    return {"g": jnp.ones((dim,), jnp.float32), "b": jnp.zeros((dim,), jnp.float32)}


def init_mha_self(pg, d):
    return {"qkv": init_linear(pg, d, 3 * d), "o": init_linear(pg, d, d)}


def init_mha_cross(pg, d):
    return {"q": init_linear(pg, d, d), "kv": init_linear(pg, d, 2 * d), "o": init_linear(pg, d, d)}


def init_mlp(pg, din, dhidden, dout):
    return {"fc1": init_linear(pg, din, dhidden), "fc2": init_linear(pg, dhidden, dout)}


def init_attn_block(pg, hidden, mlp_ratio):
    return {"attn": init_mha_self(pg, hidden),
            "mlp": init_mlp(pg, hidden, int(hidden * mlp_ratio), hidden)}


def init_cross_block(pg, hidden, mlp_ratio):
    return {"attn": init_mha_cross(pg, hidden),
            "mlp": init_mlp(pg, hidden, int(hidden * mlp_ratio), hidden),
            "norm_context": init_ln(hidden)}


def init_rcu(pg, f):
    return {"conv1": init_conv(pg, f, f, 3), "conv2": init_conv(pg, f, f, 3)}


def init_fusion(pg, f, has_residual=True):
    d = {"out_conv": init_linear(pg, f, f), "rcu2": init_rcu(pg, f)}
    if has_residual:
        d["rcu1"] = init_rcu(pg, f)
    return d


# --------------------------------------------------------------------------------------
# DPT feature extractor (feature_only=True, down_ratio=2, pos_embed=False), NHWC
# --------------------------------------------------------------------------------------
def rcu_forward(p, x):
    out = jax.nn.relu(x)
    out = conv2d(out, p["conv1"], stride=1, padding=1, act="relu")   # following ReLU fused
    out = conv2d(out, p["conv2"], stride=1, padding=1)
    return out + x


def fusion_forward(p, x, res=None, size=None):
    out = x
    if res is not None:
        out = out + rcu_forward(p["rcu1"], res)
    out = rcu_forward(p["rcu2"], out)
    # 1x1 out_conv applied BEFORE the bilinear upsample (both linear -> exact commute):
    # the GEMM runs on 4x fewer pixels and writes 4x fewer bytes.
    out = linear(out, p["out_conv"], out_dtype=jnp.bfloat16)
    if size is None:
        size = (out.shape[1] * 2, out.shape[2] * 2)
    out = interpolate_bilinear(out, size[0], size[1])
    return out


def dpt_forward(p, aggregated_tokens_list, images, patch_start_idx,
                patch_size, down_ratio, intermediate_layer_idx):
    B, S, _, H, W = images.shape
    ph, pw = H // patch_size, W // patch_size
    outs = []
    for dpt_idx, layer_idx in enumerate(intermediate_layer_idx):
        x = aggregated_tokens_list[layer_idx][:, :, patch_start_idx:, :]   # (B, S, P, dim_in)
        dim = x.shape[-1]
        x = x.reshape(B * S, -1, dim)
        x = layernorm_pallas(x, p["norm"]["g"], p["norm"]["b"], out_dtype=jnp.bfloat16)
        xt = linear(x, p["projects"][dpt_idx], out_dtype=jnp.bfloat16)      # 1x1 conv
        oc = p["projects"][dpt_idx]["w"].shape[1]
        xm = xt.reshape(B * S, ph, pw, oc)                                  # NHWC
        if dpt_idx == 0:
            xm = conv_transpose_k_eq_s(xm, p["resize0"])
        elif dpt_idx == 1:
            xm = conv_transpose_k_eq_s(xm, p["resize1"])
        elif dpt_idx == 3:
            xm = conv2d(xm, p["resize3"], stride=2, padding=1)
        outs.append(xm)

    rn = [conv2d(outs[i], p["layer_rn"][i], stride=1, padding=1) for i in range(4)]
    out = fusion_forward(p["refinenet4"], rn[3], None, size=rn[2].shape[1:3])
    out = fusion_forward(p["refinenet3"], out, rn[2], size=rn[1].shape[1:3])
    out = fusion_forward(p["refinenet2"], out, rn[1], size=rn[0].shape[1:3])
    out = fusion_forward(p["refinenet1"], out, rn[0], size=None)
    out = conv2d(out, p["output_conv1"], stride=1, padding=1)
    out = interpolate_bilinear(out, int(ph * patch_size / down_ratio),
                               int(pw * patch_size / down_ratio))
    return out.reshape(B, S, out.shape[1], out.shape[2], out.shape[3])      # (B, S, H', W', C)


# --------------------------------------------------------------------------------------
# Tracker (BaseTrackerPredictor with EfficientUpdateFormer)
# --------------------------------------------------------------------------------------
def self_attention(p, x, num_heads):
    B, T, D = x.shape
    dh = D // num_heads
    qkv = linear(x, p["qkv"], out_dtype=jnp.bfloat16)             # fused q/k/v projection
    q, k, v = jnp.split(qkv, 3, axis=-1)

    def sh(t):
        return t.reshape(B, T, num_heads, dh).transpose(0, 2, 1, 3)

    out = attention_pallas(sh(q), sh(k), sh(v), 1.0 / (dh ** 0.5), out_dtype=jnp.bfloat16)
    out = out.transpose(0, 2, 1, 3).reshape(B, T, D)
    return linear(out, p["o"], out_dtype=jnp.bfloat16)


def cross_attention(p, x, ctx, num_heads):
    B, Tq, D = x.shape
    Tk = ctx.shape[1]
    dh = D // num_heads
    q = linear(x, p["q"], out_dtype=jnp.bfloat16)
    kv = linear(ctx, p["kv"], out_dtype=jnp.bfloat16)             # fused k/v projection
    k, v = jnp.split(kv, 2, axis=-1)

    def sh(t, T):
        return t.reshape(B, T, num_heads, dh).transpose(0, 2, 1, 3)

    out = attention_pallas(sh(q, Tq), sh(k, Tk), sh(v, Tk), 1.0 / (dh ** 0.5),
                           out_dtype=jnp.bfloat16)
    out = out.transpose(0, 2, 1, 3).reshape(B, Tq, D)
    return linear(out, p["o"], out_dtype=jnp.bfloat16)


def mlp_forward(p, x, out_dtype=jnp.bfloat16):
    h = linear(x, p["fc1"], out_dtype=jnp.bfloat16)
    # exact erf GELU (matches PyTorch nn.GELU default); applied outside the Pallas kernel.
    h = jax.nn.gelu(h, approximate=False)
    return linear(h, p["fc2"], out_dtype=out_dtype)


def attn_block_forward(p, x, num_heads):
    xn = ln_noaffine(x)
    x = x + self_attention(p["attn"], xn, num_heads)
    x = x + mlp_forward(p["mlp"], ln_noaffine(x))
    return x


def cross_attn_block_forward(p, x, context, num_heads):
    xn = ln_noaffine(x)
    cn = layernorm_pallas(context, p["norm_context"]["g"], p["norm_context"]["b"], eps=1e-5)
    x = x + cross_attention(p["attn"], xn, cn, num_heads)
    x = x + mlp_forward(p["mlp"], ln_noaffine(x))
    return x


def updateformer_forward(p, x, num_heads, num_virtual, time_depth, space_depth):
    B, N, T, _ = x.shape
    tokens = linear(x, p["input_transform"], out_dtype=jnp.bfloat16)
    init_tokens = tokens
    virt = jnp.tile(p["virtual_tracks"].astype(tokens.dtype), (B, 1, T, 1))
    tokens = jnp.concatenate([tokens, virt], axis=1)
    Ntot = tokens.shape[1]
    hidden = tokens.shape[-1]
    j = 0
    ratio = max(time_depth // space_depth, 1)
    for i in range(time_depth):
        time_tokens = tokens.reshape(B * Ntot, T, hidden)
        time_tokens = attn_block_forward(p["time_blocks"][i], time_tokens, num_heads)
        tokens = time_tokens.reshape(B, Ntot, T, hidden)
        if (i % ratio == 0) and (j < space_depth):
            space_tokens = tokens.transpose(0, 2, 1, 3).reshape(B * T, Ntot, hidden)
            point_tokens = space_tokens[:, : Ntot - num_virtual]
            virtual_tokens = space_tokens[:, Ntot - num_virtual:]
            virtual_tokens = cross_attn_block_forward(p["space_virtual2point_blocks"][j],
                                                      virtual_tokens, point_tokens, num_heads)
            virtual_tokens = attn_block_forward(p["space_virtual_blocks"][j], virtual_tokens, num_heads)
            point_tokens = cross_attn_block_forward(p["space_point2virtual_blocks"][j],
                                                    point_tokens, virtual_tokens, num_heads)
            space_tokens = jnp.concatenate([point_tokens, virtual_tokens], axis=1)
            tokens = space_tokens.reshape(B, T, Ntot, hidden).transpose(0, 2, 1, 3)
            j += 1
    tokens = tokens[:, : Ntot - num_virtual]
    tokens = tokens + init_tokens
    return linear(tokens, p["flow_head"])                # f32 deltas (lane-padded GEMM output)


def corr_sample(pyramid, targets, coords, radius):
    B, S, N, C = targets.shape
    t2 = targets.reshape(B * S, N, C)
    r = radius
    dx = jnp.linspace(-r, r, 2 * r + 1)
    dgx, dgy = jnp.meshgrid(dx, dx)
    delta = jnp.stack([dgx, dgy], axis=-1).reshape(1, -1, 2)
    inv_sqrt_c = 1.0 / (float(C) ** 0.5)
    out_pyramid = []
    for lvl, fm in enumerate(pyramid):
        H, W = fm.shape[2], fm.shape[3]
        fmat = fm.reshape(B * S, H * W, C)
        # 1/sqrt(C) fused into the MXU epilogue; corr volume stored as bf16 (half the HBM traffic)
        corrs = bmm_nt_pallas(t2, fmat, scale=inv_sqrt_c, out_dtype=jnp.bfloat16)
        corrs = corrs.reshape(B * S * N, H, W, 1)
        centroid = coords.reshape(B * S * N, 1, 2) / (2.0 ** lvl)
        coords_lvl = centroid + delta
        sampled = bilinear_sample(corrs, coords_lvl, padding_mode="zeros")
        out_pyramid.append(sampled.reshape(B, S, N, -1))
    # TODO(synk): fully fuse correlation + (2r+1)^2 window sampling so the corr volume never
    # round-trips HBM (compute only the sampled positions via scalar-prefetched coords).
    return jnp.concatenate(out_pyramid, axis=3)


def tracker_forward(p, query_points, fmaps, iters, cfg):
    # fmaps: (B, S, H, W, C) NHWC (bf16)
    B, N, _ = query_points.shape
    _, S, HH, WW, C = fmaps.shape
    latent = cfg["latent_dim"]
    stride = cfg["stride"]

    fmaps = layernorm_pallas(fmaps, p["fmap_norm"]["g"], p["fmap_norm"]["b"])   # LN over C

    qp = query_points / float(stride)
    coords = jnp.tile(qp.reshape(B, 1, N, 2), (1, S, 1, 1))
    query_track_feat = sample_features4d(fmaps[:, 0], coords[:, 0])
    track_feats = jnp.tile(query_track_feat[:, None], (1, S, 1, 1))
    coords_backup = coords

    pyramid = [fmaps]
    for _ in range(cfg["corr_levels"] - 1):
        prev = pyramid[-1]
        pooled = avg_pool2x2(prev.reshape(B * S, prev.shape[2], prev.shape[3], C))
        pyramid.append(pooled.reshape(B, S, pooled.shape[1], pooled.shape[2], C))

    tdim = cfg["transformer_dim"]
    pos_embed = get_2d_sincos_pos_embed(tdim, (HH, WW))
    sampled_pos_emb = sample_features4d(jnp.tile(pos_embed, (B, 1, 1, 1)), coords[:, 0])
    sampled_pos_emb = sampled_pos_emb.reshape(B * N, 1, tdim)

    coord_preds = []
    for _ in range(iters):
        fcorrs = corr_sample(pyramid, track_feats, coords, cfg["corr_radius"])
        corr_dim = fcorrs.shape[3]
        fcorrs_ = fcorrs.transpose(0, 2, 1, 3).reshape(B * N, S, corr_dim)
        fcorrs_ = mlp_forward(p["corr_mlp"], fcorrs_, out_dtype=jnp.float32)

        flows = (coords - coords[:, 0:1]).transpose(0, 2, 1, 3).reshape(B * N, S, 2)
        flows_emb = get_2d_embedding(flows, cfg["flows_emb_dim"])
        flows_emb = jnp.concatenate([flows_emb, flows / HH, flows / WW], axis=-1)

        track_feats_ = track_feats.transpose(0, 2, 1, 3).reshape(B * N, S, latent)
        transformer_input = jnp.concatenate(
            [flows_emb, fcorrs_, track_feats_.astype(jnp.float32)], axis=2)

        x = transformer_input + sampled_pos_emb
        qrt = jnp.concatenate([p["query_ref_token"][:, 0:1],
                               jnp.tile(p["query_ref_token"][:, 1:2], (1, S - 1, 1))], axis=1)
        x = x + qrt
        x = x.reshape(B, N, S, tdim)

        delta = updateformer_forward(p["updateformer"], x, cfg["num_heads"],
                                     cfg["num_virtual_tracks"], cfg["time_depth"], cfg["space_depth"])
        delta = delta.reshape(B * N, S, -1)
        delta_coords_ = delta[:, :, :2]
        delta_feats_ = delta[:, :, 2:]

        track_flat = track_feats_.reshape(B * N * S, latent).astype(jnp.float32)
        delta_flat = delta_feats_.reshape(B * N * S, latent)
        dn = layernorm_pallas(delta_flat, p["ffeat_norm"]["g"], p["ffeat_norm"]["b"])   # GroupNorm(1, C)
        upd = jax.nn.gelu(linear(dn, p["ffeat_updater"]), approximate=False)
        track_flat = upd + track_flat
        track_feats = track_flat.reshape(B, N, S, latent).transpose(0, 2, 1, 3)

        coords = coords + delta_coords_.reshape(B, N, S, 2).transpose(0, 2, 1, 3)
        coords = coords.at[:, 0].set(coords_backup[:, 0])
        coord_preds.append(coords * stride)

    tf_flat = track_feats.reshape(B * S * N, latent)
    vc = linear(tf_flat, p["vis_conf_predictor"])          # fused vis/conf head (lane-padded GEMM)
    vis = jax.nn.sigmoid(vc[:, 0]).reshape(B, S, N)
    conf = None
    if cfg["predict_conf"]:
        conf = jax.nn.sigmoid(vc[:, 1]).reshape(B, S, N)
    return coord_preds, vis, conf


# --------------------------------------------------------------------------------------
# TrackHead
# --------------------------------------------------------------------------------------
class TrackHead:
    def __init__(self, dim_in, patch_size=14, features=128, iters=4, predict_conf=True,
                 stride=2, corr_levels=7, corr_radius=4, hidden_size=384,
                 out_channels=(256, 512, 1024, 1024), intermediate_layer_idx=(0, 1, 2, 3),
                 num_heads=8, num_virtual_tracks=64, time_depth=6, space_depth=6, mlp_ratio=4.0,
                 key=None):
        if key is None:
            key = jax.random.PRNGKey(0)
        pg = ParamGen(key)
        self.patch_size = patch_size
        self.iters = iters
        self.down_ratio = 2
        self.intermediate_layer_idx = tuple(intermediate_layer_idx)
        oc = list(out_channels)

        # DPTHead(feature_only=True, down_ratio=2, pos_embed=False)
        self.dpt_params = {
            "norm": init_ln(dim_in),
            "projects": [init_linear(pg, dim_in, c) for c in oc],
            "resize0": init_convT(pg, oc[0], oc[0], 4),
            "resize1": init_convT(pg, oc[1], oc[1], 2),
            "resize3": init_conv(pg, oc[3], oc[3], 3),
            "layer_rn": [init_conv(pg, c, features, 3, bias=False) for c in oc],
            "refinenet1": init_fusion(pg, features, True),
            "refinenet2": init_fusion(pg, features, True),
            "refinenet3": init_fusion(pg, features, True),
            "refinenet4": init_fusion(pg, features, False),
            "output_conv1": init_conv(pg, features, features, 3),
        }

        # BaseTrackerPredictor
        latent = features
        flows_emb_dim = latent // 2
        transformer_dim = latent + latent + latent + 4
        corr_in = corr_levels * (2 * corr_radius + 1) ** 2
        self.tracker_cfg = {
            "latent_dim": latent, "stride": stride, "corr_levels": corr_levels,
            "corr_radius": corr_radius, "flows_emb_dim": flows_emb_dim,
            "transformer_dim": transformer_dim, "num_heads": num_heads,
            "num_virtual_tracks": num_virtual_tracks, "time_depth": time_depth,
            "space_depth": space_depth, "predict_conf": predict_conf,
        }
        self.tracker_params = {
            "fmap_norm": init_ln(latent),
            "corr_mlp": init_mlp(pg, corr_in, hidden_size, latent),
            "query_ref_token": pg.normal((1, 2, transformer_dim), 1.0),
            "ffeat_norm": init_ln(latent),
            "ffeat_updater": init_linear(pg, latent, latent),
            # vis + conf fused into a single (latent -> 2) GEMM (lane-padded output)
            "vis_conf_predictor": init_linear(pg, latent, 2 if predict_conf else 1),
            "updateformer": {
                "input_transform": init_linear(pg, transformer_dim, hidden_size),
                "flow_head": init_linear(pg, hidden_size, latent + 2),
                "virtual_tracks": pg.normal((1, num_virtual_tracks, 1, hidden_size), 1.0),
                "time_blocks": [init_attn_block(pg, hidden_size, mlp_ratio) for _ in range(time_depth)],
                "space_virtual_blocks": [init_attn_block(pg, hidden_size, mlp_ratio) for _ in range(space_depth)],
                "space_point2virtual_blocks": [init_cross_block(pg, hidden_size, mlp_ratio) for _ in range(space_depth)],
                "space_virtual2point_blocks": [init_cross_block(pg, hidden_size, mlp_ratio) for _ in range(space_depth)],
            },
        }

    def forward(self, aggregated_tokens_list, images, patch_start_idx, query_points=None, iters=None):
        assert query_points is not None  # TODO(synk): query-point auto-initialization path not implemented
        if iters is None:
            iters = self.iters
        feature_maps = dpt_forward(self.dpt_params, aggregated_tokens_list, images, patch_start_idx,
                                   self.patch_size, self.down_ratio, self.intermediate_layer_idx)
        coord_preds, vis_scores, conf_scores = tracker_forward(
            self.tracker_params, query_points, feature_maps, iters, self.tracker_cfg)
        return coord_preds, vis_scores, conf_scores


# --------------------------------------------------------------------------------------
if __name__ == "__main__":
    key = jax.random.PRNGKey(0)
    B, S, Himg, Wimg = 1, 2, 28, 28
    dim_in = 32
    patch_size = 14
    patch_start_idx = 1
    ph, pw = Himg // patch_size, Wimg // patch_size
    num_tokens = patch_start_idx + ph * pw

    ks = jax.random.split(key, 8)
    aggregated_tokens_list = [
        jax.random.normal(ks[i], (B, S, num_tokens, dim_in), jnp.float32) for i in range(4)
    ]
    images = jax.random.normal(ks[4], (B, S, 3, Himg, Wimg), jnp.float32)
    N = 6
    query_points = jax.random.uniform(ks[5], (B, N, 2), minval=1.0, maxval=float(Himg) - 2.0)

    head = TrackHead(
        dim_in=dim_in, patch_size=patch_size, features=32, iters=2, predict_conf=True,
        stride=2, corr_levels=2, corr_radius=2, hidden_size=64,
        out_channels=(32, 48, 64, 64), intermediate_layer_idx=(0, 1, 2, 3),
        num_heads=4, num_virtual_tracks=4, time_depth=2, space_depth=2, mlp_ratio=4.0,
        key=ks[6],
    )

    coord_preds, vis_scores, conf_scores = head.forward(
        aggregated_tokens_list, images, patch_start_idx, query_points=query_points)

    jax.block_until_ready((jnp.stack(coord_preds), vis_scores, conf_scores))
    assert coord_preds[-1].shape == (B, S, N, 2)
    assert vis_scores.shape == (B, S, N) and conf_scores.shape == (B, S, N)
    print("KERNEL_OK")
</pallas_src>

<mosaic_0001>
module attributes {stable_mosaic.version = 11 : i64} {
  func.func @_ln_kernel(%arg0: i32, %arg1: memref<8x32xf32, #tpu.memory_space<vmem>>, %arg2: memref<1x32xf32, #tpu.memory_space<vmem>>, %arg3: memref<1x32xf32, #tpu.memory_space<vmem>>, %arg4: memref<8x32xbf16, #tpu.memory_space<vmem>>) attributes {dimension_semantics = [#tpu.dimension_semantics<parallel>], iteration_bounds = array<i64: 1>, scalar_prefetch = 0 : i64, scratch_operands = 0 : i64, tpu.core_type = #tpu.core_type<tc>, window_params = [{transform_indices = @transform_0, window_bounds = array<i64: 8, 32>}, {pipeline_mode = #tpu.pipeline_mode<synchronous>, transform_indices = @transform_1, window_bounds = array<i64: 1, 32>}, {pipeline_mode = #tpu.pipeline_mode<synchronous>, transform_indices = @transform_2, window_bounds = array<i64: 1, 32>}, {transform_indices = @transform_3, window_bounds = array<i64: 8, 32>}]} {
    %c0 = arith.constant 0 : index
    %c0_0 = arith.constant 0 : index
    %0 = vector.load %arg1[%c0, %c0_0] : memref<8x32xf32, #tpu.memory_space<vmem>>, vector<8x32xf32>
    %cst = arith.constant dense<0.000000e+00> : vector<8xf32>
    %1 = vector.multi_reduction <add>, %0, %cst [1] : vector<8x32xf32> to vector<8xf32>
    %2 = vector.shape_cast %1 : vector<8xf32> to vector<8x1xf32>
    %cst_1 = arith.constant 3.200000e+01 : f32
    %3 = vector.broadcast %cst_1 : f32 to vector<8x1xf32>
    %4 = arith.divf %2, %3 : vector<8x1xf32>
    %5 = vector.broadcast %4 : vector<8x1xf32> to vector<8x32xf32>
    %6 = arith.subf %0, %5 : vector<8x32xf32>
    %7 = arith.mulf %6, %6 : vector<8x32xf32>
    %cst_2 = arith.constant dense<0.000000e+00> : vector<8xf32>
    %8 = vector.multi_reduction <add>, %7, %cst_2 [1] : vector<8x32xf32> to vector<8xf32>
    %9 = vector.shape_cast %8 : vector<8xf32> to vector<8x1xf32>
    %cst_3 = arith.constant 3.200000e+01 : f32
    %10 = vector.broadcast %cst_3 : f32 to vector<8x1xf32>
    %11 = arith.divf %9, %10 : vector<8x1xf32>
    %cst_4 = arith.constant 9.99999974E-6 : f32
    %12 = vector.broadcast %cst_4 : f32 to vector<8x1xf32>
    %13 = arith.addf %11, %12 : vector<8x1xf32>
    %14 = math.rsqrt %13 : vector<8x1xf32>
    %15 = vector.broadcast %14 : vector<8x1xf32> to vector<8x32xf32>
    %16 = arith.mulf %6, %15 : vector<8x32xf32>
    %c0_5 = arith.constant 0 : index
    %c0_6 = arith.constant 0 : index
    %17 = vector.load %arg2[%c0_5, %c0_6] : memref<1x32xf32, #tpu.memory_space<vmem>>, vector<1x32xf32>
    %18 = vector.broadcast %17 : vector<1x32xf32> to vector<8x32xf32>
    %19 = arith.mulf %16, %18 : vector<8x32xf32>
    %c0_7 = arith.constant 0 : index
    %c0_8 = arith.constant 0 : index
    %20 = vector.load %arg3[%c0_7, %c0_8] : memref<1x32xf32, #tpu.memory_space<vmem>>, vector<1x32xf32>
    %21 = vector.broadcast %20 : vector<1x32xf32> to vector<8x32xf32>
    %22 = arith.addf %19, %21 : vector<8x32xf32>
    %23 = arith.truncf %22 : vector<8x32xf32> to vector<8x32xbf16>
    %c0_9 = arith.constant 0 : index
    %c0_10 = arith.constant 0 : index
    %24 = vector.load %arg4[%c0_9, %c0_10] : memref<8x32xbf16, #tpu.memory_space<vmem>>, vector<8x32xbf16>
    tpu.vector_store %arg4[%c0_9, %c0_10], %23 {strides = array<i32>} : memref<8x32xbf16, #tpu.memory_space<vmem>>, vector<8x32xbf16>,
    return
  }
  func.func @transform_0(%arg0: i32) -> (i32, i32) {
    %c0_i32 = arith.constant 0 : i32
    %c0_i32_0 = arith.constant 0 : i32
    return %arg0, %c0_i32 : i32, i32
  }
  func.func @transform_1(%arg0: i32) -> (i32, i32) {
    %c0_i32 = arith.constant 0 : i32
    %c0_i32_0 = arith.constant 0 : i32
    %c0_i32_1 = arith.constant 0 : i32
    return %c0_i32, %c0_i32_0 : i32, i32
  }
  func.func @transform_2(%arg0: i32) -> (i32, i32) {
    %c0_i32 = arith.constant 0 : i32
    %c0_i32_0 = arith.constant 0 : i32
    %c0_i32_1 = arith.constant 0 : i32
    return %c0_i32, %c0_i32_0 : i32, i32
  }
  func.func @transform_3(%arg0: i32) -> (i32, i32) {
    %c0_i32 = arith.constant 0 : i32
    %c0_i32_0 = arith.constant 0 : i32
    return %arg0, %c0_i32 : i32, i32
  }
}

</mosaic_0001>

<bundles_post_ra>
// kernel: tpu_custom_call.1
= control target key start
LH: loop header
LB: loop body
LE: loop exit
PB: predicated region body
PF: predicated region fallthrough
CT: control target
= control target key end

     0   :  { %8 = vsyncpa [#allocation3], 0  ;;  %s231_s0 = inlined_call_operand.hbm [shape: f32[8,32], index: 0, kind: input, shape index: {}]   ;;  %s232_s1 = inlined_call_operand.hbm [shape: f32[1,32], index: 1, kind: input, shape index: {}]   ;;  %s233_s2 = inlined_call_operand.vmem [shape: f32[1,32], index: 2, kind: input, shape index: {}]   ;;  %s234_s3 = inlined_call_operand.hbm [shape: bf16[8,32], index: 3, kind: output, shape index: {}]  }
   0x1   :  { %9 = vsyncpa [#allocation6], 0 }
   0x2   :  { %10 = vsyncpa [#allocation4], 0  ;;  %s16_s14 = sshll.u32 %s231_s0, 4  ;;  %s193_s15 = smov [#allocation2]   ;;  %s17_s14 = int_to_ptr.hbm [resolvable:$true] %s16_s14 }
   0x3   :  { %s18_s16 = sshll.u32 %s193_s15, 4  ;;  %s27_s19 = sshll.u32 %s232_s1, 4  ;;  %s19_s16 = int_to_ptr.vmem [resolvable:$true] %s18_s16  ;;  %s28_s19 = int_to_ptr.hbm [resolvable:$true] %s27_s19 }
   0x4   :  { %21 = dma.hbm_to_vmem [thread:$0]  %s17_s14, 128, %s19_s16, [#allocation3]  }
   0x5   :  { %s194_s20 = smov [#allocation5]  }
   0x6   :  { %s29_s21 = sshll.u32 %s194_s20, 4  ;;  %s30_s21 = int_to_ptr.vmem [resolvable:$true] %s29_s21 }
   0x7   :  { %32 = dma.hbm_to_vmem [thread:$0]  %s28_s19, 16, %s30_s21, [#allocation6]  }
   0x8   :  { %187 = dma.done.wait [#allocation3], 128  }
   0x9   :  { %188 = vsyncadd [#allocation3], 4294967168 }
   0xa   :  { %189 = dma.done.wait [#allocation6], 16  }
   0xb   :  { %190 = vsyncadd [#allocation6], 4294967280  ;;  %vm44_vm0 = vcmask 261120   ;;  %v43_v0 = vld [vmem:[#allocation2] sm:$0xff]  ;;  %v195_v2 = vmov 32.0   ;;  %s196_s22 = smov [#allocation7]  }
   0xc   :  { %v45_v1 = vsel %vm44_vm0, %v43_v0, 0.0  ;;  %111 = vrcp.f32 %v195_v2  ;;  %v109_v23 = vld [vmem:[#allocation5] ss:$0 sm:$0xff]  ;;  %v110_v26 = vld [vmem:[%s233_s2] ss:$0 sm:$0xff]  ;;  %s92_s23 = sshll.u32 %s196_s22, 4  ;;  %s93_s23 = int_to_ptr.vmem [resolvable:$true] %s92_s23 }
   0xd   :  { %46 = vadd.xlane.f32.xlu0 %v45_v1  ;;  %s94_s26 = sshll.u32 %s234_s3, 4  ;;  %vm85_vm5 = vcmask 257024   ;;  %s95_s26 = int_to_ptr.hbm [resolvable:$true] %s94_s26 }
  0x12   :  { %v112_v3 = vpop.eup %111 }
  0x13   :  { %v49_v4 = vmul.f32 32.0, %v112_v3  ;;  %vm53_vm1 = vweird.f32 %v112_v3 }
  0x15   :  { %v50_v5 = vsub.f32 1.0, %v49_v4 }
  0x17   :  { %v51_v6 = vmul.f32 %v112_v3, %v50_v5 }
  0x19   :  { %v52_v7 = vadd.f32 %v112_v3, %v51_v6 }
  0x1b   :  { %v54_v8 = vsel %vm53_vm1, %v112_v3, %v52_v7 }
  0x80   :  { %v47_v9 = vpop.xlane.xlu0 %46 }
  0x81   :  { %v55_v10 = vmul.f32 %v54_v8, %v47_v9 }
  0x83   :  { %v56_v11 = vsub.f32 %v43_v0, %v55_v10 }
  0x85   :  { %v57_v12 = vmul.f32 %v56_v11, %v56_v11 }
  0x87   :  { %v58_v13 = vsel %vm44_vm0, %v57_v12, 0.0 }
  0x88   :  { %59 = vadd.xlane.f32.xlu0 %v58_v13 }
  0xfb   :  { %v60_v14 = vpop.xlane.xlu0 %59 }
  0xfc   :  { %v61_v15 = vmul.f32 %v60_v14, %v54_v8 }
  0xfe   :  { %v62_v16 = vadd.f32 1e-05, %v61_v15 }
 0x100   :  { %113 = vrsqrt.f32 %v62_v16  ;;  %vm69_vm3 = vweird.f32 %v62_v16 }
 0x106   :  { %v114_v17 = vpop.eup %113 }
 0x107   :  { %v64_v18 = vmul.f32 %v114_v17, %v62_v16  ;;  %vm70_vm2 = vweird.f32 %v114_v17 }
 0x108   :  { %vm71_vm4 = vmor %vm69_vm3, %vm70_vm2 }
 0x109   :  { %v65_v19 = vmul.f32 %v114_v17, %v64_v18 }
 0x10b   :  { %v66_v20 = vmul.f32 0.5, %v65_v19 }
 0x10d   :  { %v67_v21 = vsub.f32 1.5, %v66_v20 }
 0x10f   :  { %v68_v22 = vmul.f32 %v114_v17, %v67_v21 }
 0x111   :  { %v72_v24 = vsel %vm71_vm4, %v114_v17, %v68_v22 }
 0x112   :  { %v73_v25 = vmul.f32 %v72_v24, %v56_v11 }
 0x114   :  { %v78_v27 = vmul.f32 %v109_v23, %v73_v25 }
 0x116   :  { %v83_v28 = vadd.f32 %v110_v26, %v78_v27 }
 0x118   :  { %v84_v29 = vpack.c.bf16 %v83_v28, %v83_v28 }
 0x11a   :  { %86 = vst.msk [vmem:[#allocation7] sm:$0xf] %vm85_vm5, %v84_v29 }
 0x11b   :  { %97 = dma.vmem_to_hbm [thread:$0]  %s93_s23, 64, %s95_s26, [#allocation4]  }
 0x11c   :  { %191 = dma.done.wait [#allocation4], 64  }
 0x11d   :  { %192 = vsyncadd [#allocation4], 4294967232 }
 0x11e   :  { %102 = vsyncpa [#allocation3], 1 }
 0x11f   :  { %103 = vsyncpa [#allocation6], 1 }
 0x120   :  { %104 = vsyncpa [#allocation4], 1 }

</bundles_post_ra>
